<compile_context>
chip_gen: v7x
topology: tpu7x:2x2x1
jax: 0.10.0
libtpu: 0.0.40
codegen_flags: <defaults>
</compile_context>

<pallas_src>
import jax
import jax.numpy as jnp
from jax import lax
from jax.experimental import pallas as pl
from jax.experimental.pallas import tpu as pltpu


def _cvn_kernel(x_ref, g_ref, o_ref):
    # x_ref: (1, Ct, HW)   lane-dense flattened spatial axis
    # g_ref: (1, Ct, 1)    per-(n, c) conditional gamma
    # o_ref: (1, Ct, HW)
    x = x_ref[...]
    xf = x.astype(jnp.float32)          # f32 accumulation for the reductions
    hw = xf.shape[-1]

    # Two-pass unbiased variance over the flattened spatial axis.
    mean = jnp.sum(xf, axis=-1, keepdims=True) * (1.0 / hw)
    diff = xf - mean
    var = jnp.sum(diff * diff, axis=-1, keepdims=True) * (1.0 / (hw - 1))

    # Fold gamma and 1/sqrt(var + eps) into a single per-channel scale.
    # rsqrt on the tiny (1, Ct, 1) tensor hits the EUP slot (free); the big
    # block then only sees one multiply before the store.
    scale = g_ref[...].astype(jnp.float32) * lax.rsqrt(var + 1e-5)

    o_ref[...] = (xf * scale).astype(o_ref.dtype)


def _pick_c_tile(c, hw, itemsize, target_bytes=2 * 1024 * 1024):
    """Pick a channel tile: multiple of 8 dividing C, ~target_bytes per block.

    Keeps (2 in + 2 out buffers + f32 temporaries) comfortably under the
    v7x 64 MiB / v5e 16 MiB-scoped VMEM budgets while staying lane-dense.
    """
    if c % 8 != 0:
        return c  # small / odd channel count: take the full C per block
    target_elems = max(target_bytes // max(itemsize, 1), 1)
    ct = (target_elems // max(hw, 1)) // 8 * 8
    ct = max(8, min(ct, c))
    while c % ct != 0:
        ct -= 8
    return ct


def conditional_variance_norm3d(x, y, embed_weight, *, c_tile=None):
    """x: (N, C, H, W), y: (N,) int, embed_weight: (num_classes, C)."""
    n, c, h, w = x.shape
    hw = h * w

    # Glue: embedding gather + lane-dense layout plumbing (no compute hoisted).
    x_flat = x.reshape(n, c, hw)
    gamma = jnp.take(embed_weight, y, axis=0).reshape(n, c, 1)  # (N, C, 1)

    ct = c_tile if c_tile is not None else _pick_c_tile(
        c, hw, jnp.dtype(x.dtype).itemsize)
    assert c % ct == 0, "channel tile must divide C"

    out_flat = pl.pallas_call(
        _cvn_kernel,
        out_shape=jax.ShapeDtypeStruct((n, c, hw), x.dtype),
        grid=(n, c // ct),
        in_specs=[
            pl.BlockSpec((1, ct, hw), lambda ni, ci: (ni, ci, 0)),
            pl.BlockSpec((1, ct, 1), lambda ni, ci: (ni, ci, 0)),
        ],
        out_specs=pl.BlockSpec((1, ct, hw), lambda ni, ci: (ni, ci, 0)),
        compiler_params=pltpu.CompilerParams(
            dimension_semantics=("parallel", "parallel"),
            vmem_limit_bytes=32 * 1024 * 1024,
        ),
    )(x_flat, gamma)

    return out_flat.reshape(n, c, h, w)


if __name__ == "__main__":
    key = jax.random.PRNGKey(0)
    kx, ky, kw = jax.random.split(key, 3)

    N, C, H, W = 2, 4, 16, 16
    num_classes = 10

    x = jax.random.normal(kx, (N, C, H, W), dtype=jnp.float32)
    y = jax.random.randint(ky, (N,), 0, num_classes, dtype=jnp.int32)
    # Embedding weight init: normal(mean=1, std=0.02), deterministic.
    embed_weight = 1.0 + 0.02 * jax.random.normal(
        kw, (num_classes, C), dtype=jnp.float32
    )

    out = conditional_variance_norm3d(x, y, embed_weight)
    out = jax.block_until_ready(out)

    # Pure-JAX reference (matches torch.var unbiased semantics).
    var_ref = jnp.var(x, axis=(2, 3), keepdims=True, ddof=1)
    h_ref = x / jnp.sqrt(var_ref + 1e-5)
    gamma_ref = jnp.take(embed_weight, y, axis=0).reshape(N, C, 1, 1)
    ref = gamma_ref * h_ref

    assert jnp.allclose(out, ref, atol=1e-5, rtol=1e-5), "mismatch vs reference"
    print("KERNEL_OK")
</pallas_src>

<mosaic_0001>
module attributes {stable_mosaic.version = 11 : i64} {
  func.func @_cvn_kernel(%arg0: i32, %arg1: i32, %arg2: memref<1x4x256xf32, #tpu.memory_space<vmem>>, %arg3: memref<1x4x1xf32, #tpu.memory_space<vmem>>, %arg4: memref<1x4x256xf32, #tpu.memory_space<vmem>>) attributes {dimension_semantics = [#tpu.dimension_semantics<parallel>, #tpu.dimension_semantics<parallel>], iteration_bounds = array<i64: 2, 1>, scalar_prefetch = 0 : i64, scratch_operands = 0 : i64, tpu.core_type = #tpu.core_type<tc>, window_params = [{transform_indices = @transform_0, window_bounds = array<i64: 1, 4, 256>}, {transform_indices = @transform_1, window_bounds = array<i64: 1, 4, 1>}, {transform_indices = @transform_2, window_bounds = array<i64: 1, 4, 256>}]} {
    %c0 = arith.constant 0 : index
    %c0_0 = arith.constant 0 : index
    %c0_1 = arith.constant 0 : index
    %0 = vector.load %arg2[%c0, %c0_0, %c0_1] : memref<1x4x256xf32, #tpu.memory_space<vmem>>, vector<1x4x256xf32>
    %cst = arith.constant dense<0.000000e+00> : vector<1x4xf32>
    %1 = vector.multi_reduction <add>, %0, %cst [2] : vector<1x4x256xf32> to vector<1x4xf32>
    %2 = vector.shape_cast %1 : vector<1x4xf32> to vector<1x4x1xf32>
    %cst_2 = arith.constant 3.906250e-03 : f32
    %3 = vector.broadcast %cst_2 : f32 to vector<1x4x1xf32>
    %4 = arith.mulf %2, %3 : vector<1x4x1xf32>
    %5 = vector.broadcast %4 : vector<1x4x1xf32> to vector<1x4x256xf32>
    %6 = arith.subf %0, %5 : vector<1x4x256xf32>
    %7 = arith.mulf %6, %6 : vector<1x4x256xf32>
    %cst_3 = arith.constant dense<0.000000e+00> : vector<1x4xf32>
    %8 = vector.multi_reduction <add>, %7, %cst_3 [2] : vector<1x4x256xf32> to vector<1x4xf32>
    %9 = vector.shape_cast %8 : vector<1x4xf32> to vector<1x4x1xf32>
    %cst_4 = arith.constant 0.00392156886 : f32
    %10 = vector.broadcast %cst_4 : f32 to vector<1x4x1xf32>
    %11 = arith.mulf %9, %10 : vector<1x4x1xf32>
    %c0_5 = arith.constant 0 : index
    %c0_6 = arith.constant 0 : index
    %c0_7 = arith.constant 0 : index
    %12 = vector.load %arg3[%c0_5, %c0_6, %c0_7] : memref<1x4x1xf32, #tpu.memory_space<vmem>>, vector<1x4x1xf32>
    %cst_8 = arith.constant 9.99999974E-6 : f32
    %13 = vector.broadcast %cst_8 : f32 to vector<1x4x1xf32>
    %14 = arith.addf %11, %13 : vector<1x4x1xf32>
    %15 = math.rsqrt %14 : vector<1x4x1xf32>
    %16 = arith.mulf %12, %15 : vector<1x4x1xf32>
    %17 = vector.broadcast %16 : vector<1x4x1xf32> to vector<1x4x256xf32>
    %18 = arith.mulf %0, %17 : vector<1x4x256xf32>
    %c0_9 = arith.constant 0 : index
    %c0_10 = arith.constant 0 : index
    %c0_11 = arith.constant 0 : index
    %19 = vector.load %arg4[%c0_9, %c0_10, %c0_11] : memref<1x4x256xf32, #tpu.memory_space<vmem>>, vector<1x4x256xf32>
    tpu.vector_store %arg4[%c0_9, %c0_10, %c0_11], %18 {strides = array<i32>} : memref<1x4x256xf32, #tpu.memory_space<vmem>>, vector<1x4x256xf32>,
    return
  }
  func.func @transform_0(%arg0: i32, %arg1: i32) -> (i32, i32, i32) {
    %c0_i32 = arith.constant 0 : i32
    %c0_i32_0 = arith.constant 0 : i32
    return %arg0, %arg1, %c0_i32 : i32, i32, i32
  }
  func.func @transform_1(%arg0: i32, %arg1: i32) -> (i32, i32, i32) {
    %c0_i32 = arith.constant 0 : i32
    %c0_i32_0 = arith.constant 0 : i32
    return %arg0, %arg1, %c0_i32 : i32, i32, i32
  }
  func.func @transform_2(%arg0: i32, %arg1: i32) -> (i32, i32, i32) {
    %c0_i32 = arith.constant 0 : i32
    %c0_i32_0 = arith.constant 0 : i32
    return %arg0, %arg1, %c0_i32 : i32, i32, i32
  }
}

</mosaic_0001>

<bundles_post_ra>
// kernel: tpu_custom_call.1
= control target key start
LH: loop header
LB: loop body
LE: loop exit
PB: predicated region body
PF: predicated region fallthrough
CT: control target
= control target key end

     0   :  { %7 = vsyncpa [#allocation3], 0  ;;  %s776_s0 = inlined_call_operand.hbm [shape: f32[2,4,256], index: 0, kind: input, shape index: {}]   ;;  %s777_s1 = inlined_call_operand.vmem [shape: f32[2,4,1], index: 1, kind: input, shape index: {}]   ;;  %s778_s2 = inlined_call_operand.hbm [shape: f32[2,4,256], index: 2, kind: output, shape index: {}]  }
   0x1   :  { %9 = vsyncpa [#allocation3 + $0x1], 0 }
   0x2   :  { %10 = vsyncpa [#allocation4], 0 }
   0x3   :  { %12 = vsyncpa [#allocation4 + $0x1], 0  ;;  %s591_s9 = smov 0   ;;  %s593_s10 = smov 0  }
   0x4   :  { %s595_s11 = smov 0   ;;  %s597_s12 = smov 0  }
   0x5   :  { %s599_s13 = smov 0   ;;  %s601_s14 = smov 0  }
   0x6 LB: > { %s371_s15 = sadd.s32 4294967295, %s570_s14   ;;  %s372_s16 = sadd.s32 4294967294, %s570_s14   ;;  %s570_s14 = sphi %s601_s14, %s18_s14   ;;  %s566_s13 = sphi %s599_s13, %s794_s13   ;;  %s562_s12 = sphi %s597_s12, %s793_s12   ;;  %s558_s11 = sphi %s595_s11, %s792_s11   ;;  %s554_s10 = sphi %s593_s10, %s791_s10   ;;  %s550_s9 = sphi %s591_s9, %s790_s9  }
   0x7   : > { %s30_s17 = sadd.s32 1, %s566_s13  ;;  %s39_s18 = sadd.s32 1, %s558_s11 }
   0x8   : > { %p32_p0 = scmp.ge.s32.totalorder %s30_s17, 2  ;;  %p46_p1 = scmp.ne.s32.totalorder %s558_s11, %s554_s10 }
   0x9   : > { %p47_p2 = scmp.eq.s32.totalorder %s570_s14, 0  ;;  %p52_p3 = scmp.ne.s32.totalorder %s554_s10, %s550_s9 }
   0xa   : > { %s796_s17 = smov (%p32_p0, %s30_s17), 0  ;;  %p53_p5 = scmp.eq.s32.totalorder %s371_s15, 0 }
   0xb   : > { %p632_p4 = por %p47_p2, %p46_p1  ;;  %s34_s20 = ssub.s32 %s566_s13, %s796_s17 }
   0xc   : > { %p106_p6 = scmp.eq.s32.totalorder %s371_s15, 1  ;;  %p37_p7 = scmp.eq.s32.totalorder %s34_s20, 0 }
   0xd   : > { %p638_p8 = por %p53_p5, %p52_p3  ;;  %p112_p10 = scmp.eq.s32.totalorder %s372_s16, 1 }
   0xe   : > { %p642_p9 = por %p106_p6, %p46_p1  ;;  %p401_p13 = scmp.lt.s32.totalorder %s570_s14, 2 }
   0xf   : > { %s647_s23 = scalar_select %p37_p7, %s558_s11, %s39_s18  }
  0x10   : > { %s782_s22 = scalar_select %p642_p9, 1, 0 }
  0x11   : > { %p649_p11 = por %p112_p10, %p52_p3  ;;  %s132_s25 = sand.u32 1, %s558_s11  }
  0x12   : > { %s375_s26 = sshll.u32 %s132_s25, 3  ;;  %s387_s27 = sshll.u32 %s566_s13, 7 }
  0x13   : > { %s783_s24 = scalar_select %p649_p11, 1, 0 }
  0x14   : > { %s660_s30 = scalar_lea.hbm %s776_s0, %s387_s27  ;;  %s136_s3 = scalar_lea.vmem [#allocation2], %s375_s26 }
  0x15   : > { %s146_s4 = sshll.u32 %s136_s3, 4  ;;  %p666_p0 = pnand %p401_p13, %p632_p4  ;;  %s662_s4 = int_to_ptr.vmem [resolvable:$true] %s146_s4 }
  0x16   : > { %s133_s6 = scalar_lea.sflag [#allocation3], %s132_s25  ;;  %s458_s7 = scalar_lea.hbm %s660_s30, 128 }
  0x17   : > { %p459_p3 = scmp.ne.s32.totalorder %s660_s30, %s458_s7  ;;  %p460_p5 = pneg %p666_p0 }
  0x18   : > { %s463_s16 = scalar_lea.hbm %s776_s0, 256  ;;  %p464_p4 = scmp.lt.u32.totalorder %s660_s30, %s776_s0 }
  0x19   : > { %p461_p6 = pnand %p460_p5, %p459_p3  ;;  %p465_p10 = scmp.lt.u32.totalorder %s463_s16, %s458_s7 }
  0x1a   : > { %p467_p12 = scmp.lt.u32.totalorder %s458_s7, %s660_s30 }
  0x1b   : > { %p462_p7 = pneg %p461_p6  ;;  %p466_p13 = por %p465_p10, %p464_p4 }
  0x1d   : > { %p468_p1 = por %p467_p12, %p466_p13 }
  0x1f   : > { %p469_p2 = pnand %p468_p1, %p462_p7 }
  0x21   : > { %472 = shalt.err (!%p469_p2)
}
  0x22   : > { %s473_s20 = scalar_lea.vmem %s662_s4, 128  ;;  %s572_s25 = smov [#allocation2]  }
  0x23   : > { %p474_p3 = scmp.ne.s32.totalorder %s662_s4, %s473_s20  ;;  %s478_s26 = sshll.u32 %s572_s25, 4  ;;  %s479_s26 = int_to_ptr.vmem [resolvable:$false] %s478_s26 }
  0x24   : > { %s480_s27 = scalar_lea.vmem %s479_s26, 256  ;;  %p481_p9 = scmp.lt.s32.totalorder %s662_s4, %s479_s26 }
  0x25   : > { %p476_p6 = pnand %p474_p3, %p460_p5  ;;  %p482_p4 = scmp.lt.s32.totalorder %s480_s27, %s473_s20 }
  0x27   : > { %p477_p11 = pneg %p476_p6  ;;  %p483_p10 = por %p482_p4, %p481_p9 }
  0x29   : > { %p484_p12 = pnand %p483_p10, %p477_p11 }
  0x2b   : > { %487 = shalt.err (!%p484_p12)
}
  0x2c   : > { %396 = dma.hbm_to_vmem [thread:$0]  (!%p666_p0), %s660_s30, 128, %s662_s4, %s133_s6  }
  0x2d   : > { %p785_p1 = scmp.lt.s32.totalorder %s570_s14, 3  ;;  %p786_p2 = scmp.ge.s32.totalorder %s570_s14, 1 }
  0x2f   : > { %p162_p5 = pnand %p786_p2, %p785_p1 }
  0x30   : > { %s702_s28 = sand.u32 (!%p162_p5), 1, %s554_s10  }
  0x31   : > { %165 = sbr.rel (%p162_p5) target bundleno = 523 (0x20b), region = 28  ;;  %s379_s29 = sshll.u32 (!%p162_p5), %s702_s28, 3 }
  0x32   : > { %s168_s3 = scalar_lea.sflag (!%p162_p5), [#allocation3], %s702_s28  ;;  %s171_s5 = scalar_lea.vmem (!%p162_p5), [#allocation2], %s379_s29 }
  0x38   : > { %541 = dma.done.wait (%p638_p8), %s168_s3, 128  }
  0x39   : > { %543 = vsyncadd (%p638_p8), %s168_s3, 4294967168  ;;  %vm210_vm0 = vcmask 1043456   ;;  %v206_v0 = vld [vmem:[%s171_s5] sm:$0xff]  ;;  %v573_v5 = vmov 839922192   ;;  %v221_v7 = vlaneseq  ;;  %v574_v20 = vmov 0  }
  0x3a   : > { %v208_v1 = vcombine.high %v206_v0, %v206_v0  ;;  %v211_v2 = vsel %vm210_vm0, %v206_v0, 0.0  ;;  %v219_v6 = vunpack.c.l.s4 %v573_v5  ;;  %453 = vset.pattern.permute.xlu1 %v574_v20  ;;  %454 = vset.pattern.permute.xlu0 %v574_v20  ;;  %p199_p8 = scmp.lt.s32.totalorder %s562_s12, 1  ;;  %s388_s8 = sshll.u32 %s562_s12, 7 }
  0x3b   : > { %v222_v9 = vshrl.u32 %v221_v7, 7  ;;  %s198_s15 = scalar_lea.vmem [#allocation5], %s379_s29  ;;  %s727_s20 = scalar_lea.hbm %s778_s2, %s388_s8 }
  0x3c   : > { %v212_v3 = vsel %vm210_vm0, %v208_v1, 0.0  ;;  %v220_v8 = vunpack.c.0.s8 %v219_v6  ;;  %s200_s21 = scalar_select %p199_p8, %s562_s12, 1 }
  0x3d   : > { %v213_v4 = vadd.f32 %v212_v3, %v211_v2  ;;  %s272_s16 = sshll.u32 %s198_s15, 4  ;;  %s256_s25 = scalar_lea.sflag [#allocation4], %s702_s28  ;;  %s729_s16 = int_to_ptr.vmem [resolvable:$true] %s272_s16 }
  0x3e   : > { %v223_v10 = vsub.s32 %v220_v8, %v222_v9  ;;  %s381_s30 = sshll.u32 %s200_s21, 2  ;;  %s488_s26 = scalar_lea.vmem %s729_s16, 128 }
  0x3f   : > { %214 = vadd.xlane.f32.xlu0 %v213_v4  ;;  %s205_s7 = scalar_lea.vmem %s777_s1, %s381_s30  ;;  %p489_p9 = scmp.ne.s32.totalorder %s729_s16, %s488_s26 }
  0x40   : > { %v237_v24 = vld [vmem:[%s205_s7] sm:$0xf]  ;;  %p787_p11 = scmp.ne.s32.totalorder %s782_s22, 0  ;;  %s575_s12 = smov [#allocation5]  }
  0x41   : > { %s492_s27 = sshll.u32 %s575_s12, 4  ;;  %s493_s27 = int_to_ptr.vmem [resolvable:$false] %s492_s27 }
  0x42   : > { %p490_p0 = pnand %p489_p9, %p787_p11  ;;  %s494_s29 = scalar_lea.vmem %s493_s27, 256 }
  0x43   : > { %p495_p13 = scmp.lt.s32.totalorder %s729_s16, %s493_s27  ;;  %p496_p3 = scmp.lt.s32.totalorder %s494_s29, %s488_s26 }
  0x44   : > { %p491_p7 = pneg %p490_p0 }
  0x45   : > { %p497_p6 = por %p496_p3, %p495_p13 }
  0x47   : > { %p498_p4 = pnand %p497_p6, %p491_p7 }
  0xcc   : > { %v215_v11 = vpop.xlane.xlu0 %214 }
  0xcd   : > { %v216_v12 = vmul.f32 0.00390625, %v215_v11 }
  0xcf   : > { %v224_v13 = vrot.slane %v216_v12, %v223_v10 }
  0xd1   : > { %v226_v14 = vsub.f32 %v206_v0, %v224_v13 }
  0xd3   : > { %v227_v15 = vmul.f32 %v226_v14, %v226_v14 }
  0xd5   : > { %v229_v16 = vcombine.high %v227_v15, %v227_v15  ;;  %v231_v17 = vsel %vm210_vm0, %v227_v15, 0.0 }
  0xd7   : > { %v232_v18 = vsel %vm210_vm0, %v229_v16, 0.0 }
  0xd8   : > { %v233_v19 = vadd.f32 %v232_v18, %v231_v17 }
  0xda   : > { %234 = vadd.xlane.f32.xlu0 %v233_v19 }
 0x167   : > { %v235_v21 = vpop.xlane.xlu0 %234 }
 0x168   : > { %v236_v22 = vmul.f32 0.003921569, %v235_v21 }
 0x16a   : > { %v238_v23 = vadd.f32 1e-05, %v236_v22 }
 0x16c   : > { %456 = vrsqrt.f32 %v238_v23 }
 0x176   : > { %v457_v25 = vpop.eup %456 }
 0x177   : > { %v240_v26 = vmul.f32 %v457_v25, %v237_v24 }
 0x179   : > { %243 = vperm.xlu1 %453, %v240_v26  }
 0x1f8   : > { %v244_v27 = vpop.permute.xlu1 %243 }
 0x1f9   : > { %v251_v28 = vrot.slane %v244_v27, %v223_v10 }
 0x1fb   : > { %v253_v29 = vmul.f32 %v251_v28, %v206_v0 }
 0x1fd   : > { %254 = vst [vmem:[%s198_s15] sm:$0xff] %v253_v29 }
 0x1fe   : > { %501 = shalt.err (!%p498_p4)
}
 0x1ff   : > { %s502_s28 = scalar_lea.hbm %s727_s20, 128  ;;  %s506_s21 = scalar_lea.hbm %s778_s2, 256 }
 0x200   : > { %p503_p10 = scmp.ne.s32.totalorder %s727_s20, %s502_s28  ;;  %p507_p2 = scmp.lt.u32.totalorder %s727_s20, %s778_s2 }
 0x201   : > { %p508_p5 = scmp.lt.u32.totalorder %s506_s21, %s502_s28  ;;  %p510_p9 = scmp.lt.u32.totalorder %s502_s28, %s727_s20 }
 0x202   : > { %p504_p12 = pnand %p503_p10, %p787_p11 }
 0x203   : > { %p509_p8 = por %p508_p5, %p507_p2 }
 0x204   : > { %p505_p1 = pneg %p504_p12 }
 0x205   : > { %p511_p0 = por %p510_p9, %p509_p8 }
 0x207   : > { %p512_p7 = pnand %p511_p0, %p505_p1 }
 0x209   : > { %515 = shalt.err (!%p512_p7)
}
 0x20a   : > { %391 = dma.vmem_to_hbm [thread:$0]  (%p787_p11), %s729_s16, 128, %s727_s20, %s256_s25  }
 0x20b PF: > { %s284_s6 = sand.u32 1, %s550_s9   ;;  %p788_p13 = scmp.ne.s32.totalorder %s783_s24, 0 }
 0x20c   : > { %p789_p3 = scmp.ge.s32.totalorder %s570_s14, 2  ;;  %s285_s7 = scalar_lea.sflag [#allocation4], %s284_s6 }
 0x20e   : > { %p398_p6 = pnand %p789_p3, %p788_p13 }
 0x210   : > { %545 = dma.done.wait (!%p398_p6), %s285_s7, 128  }
 0x211   : > { %547 = vsyncadd (!%p398_p6), %s285_s7, 4294967168  ;;  %s18_s14 = sadd.s32 1, %s570_s14   ;;  %s790_s9 = smov %s554_s10 }
 0x212   : > { %p15_p4 = scmp.ge.s32.totalorder %s18_s14, 4   ;;  %s791_s10 = smov %s558_s11 }
 0x213   : > { %s792_s11 = smov %s647_s23  ;;  %s793_s12 = smov %s566_s13 }
 0x214   : > { %s794_s13 = smov %s796_s17  ;;  %17 = sbr.rel (!%p15_p4) target bundleno = 6 (0x6), region = 76 }
 0x21b   :  { %290 = vsyncpa [#allocation3], 1 }
 0x21c   :  { %292 = vsyncpa [#allocation3 + $0x1], 1 }
 0x21d   :  { %293 = vsyncpa [#allocation4], 1 }
 0x21e   :  { %295 = vsyncpa [#allocation4 + $0x1], 1 }

</bundles_post_ra>
